<compile_context>
chip_gen: v6e
topology: v6e:2x2x1
jax: 0.10.0
libtpu: 0.0.40
codegen_flags: <defaults>
</compile_context>

<pallas_src>
import numpy as np
import jax
import jax.numpy as jnp
from jax import lax
from jax.experimental import pallas as pl
from jax.experimental.pallas import tpu as pltpu

BN_EPS = 1e-5
SOFTPLUS_THRESHOLD = 20.0

# Double-buffered x/W tile budget + scoped VMEM cap.  Conservative so they are
# safe on every generation (v7x has only 64 MiB physical VMEM per TensorCore).
_TILE_VMEM_BUDGET = 24 * 1024 * 1024
_VMEM_LIMIT_BYTES = 48 * 1024 * 1024


def posterior_network_kernel(x_ref, w_ref, gamma_ref, beta_ref,
                             rhs_sq_ref, rhs_lin_ref, const_ref, logc_ref,
                             out_ref, acc_ref):
    k = pl.program_id(0)

    # ---- init f32 accumulator for z on the first K-tile -----------------
    @pl.when(k == 0)
    def _():
        acc_ref[...] = jnp.zeros_like(acc_ref)

    # ---- backbone: accumulate x_tile @ w_tile ----------------------------
    # x arrives as f32 (no wrapper-side bf16 copy); the cast to bf16 right
    # before the dot is cheap VPU filler and halves nothing in HBM traffic.
    acc_ref[...] += jnp.dot(x_ref[...].astype(jnp.bfloat16), w_ref[...],
                            preferred_element_type=jnp.float32)

    # ---- epilogue on the last K-tile: BN + density + softplus ------------
    @pl.when(k == pl.num_programs(0) - 1)
    def _():
        z = acc_ref[...]                                           # (B, D) f32

        # BatchNorm1d, training mode: biased batch variance, eps=1e-5.
        # Single-pass stats; gamma*rsqrt(var+eps) folded into one scale.
        mean = jnp.mean(z, axis=0, keepdims=True)
        mean_sq = jnp.mean(z * z, axis=0, keepdims=True)
        var = jnp.maximum(mean_sq - mean * mean, 0.0)
        scale = gamma_ref[...] * lax.rsqrt(var + BN_EPS)
        shift = beta_ref[...] - mean * scale
        z_hat = z * scale + shift                                  # (B, D)

        # Per-class diagonal Gaussian log-prob as two accumulated dots
        # (no lane-axis concatenate / cross-lane relayout):
        #   log N(z|mu_c, sig_c^2) = z^2 @ (-0.5*inv_var) + z @ (mu*inv_var) + const_c
        log_probs = (jnp.dot(z_hat * z_hat, rhs_sq_ref[...],
                             preferred_element_type=jnp.float32)
                     + jnp.dot(z_hat, rhs_lin_ref[...],
                               preferred_element_type=jnp.float32)
                     + const_ref[...])                             # (B, C_pad)

        # softplus(log_probs + log_counts), beta=1, threshold=20 (torch semantics)
        y = log_probs + logc_ref[...]
        sp = jnp.log1p(jnp.exp(jnp.minimum(y, SOFTPLUS_THRESHOLD)))
        log_alphas = jnp.where(y > SOFTPLUS_THRESHOLD, y, sp)

        # lane-dense (B, 2*C_pad) slab: [log_alphas | log_probs]
        c_pad = log_probs.shape[-1]
        out_ref[:, :c_pad] = log_alphas
        out_ref[:, c_pad:] = log_probs


def _round_up(n, m):
    return -(-n // m) * m


def init_params(key, in_features, latent_dim, num_classes, counts):
    k_w, k_mu, k_ls = jax.random.split(key, 3)
    w_bb = (jax.random.normal(k_w, (in_features, latent_dim), jnp.float32)
            * 0.02)
    # BatchNorm1d defaults: weight = 1, bias = 0.
    gamma = jnp.ones((1, latent_dim), jnp.float32)
    beta = jnp.zeros((1, latent_dim), jnp.float32)
    # per-class diagonal Gaussian density parameters
    mu = jax.random.normal(k_mu, (num_classes, latent_dim), jnp.float32)
    log_sigma = 0.1 * jax.random.normal(k_ls, (num_classes, latent_dim),
                                        jnp.float32)
    inv_var = jnp.exp(-2.0 * log_sigma)                            # (C, D)

    # Pad the class axis so the fused [log_alphas | log_probs] output slab is
    # a lane-dense multiple of 128; padded classes have all-zero parameters
    # and are sliced off in the wrapper.
    c_pad = max(64, _round_up(num_classes, 64))

    def padc(a):
        return jnp.pad(a, ((0, 0), (0, c_pad - num_classes)))

    rhs_sq = padc((-0.5 * inv_var).T)                              # (D, C_pad)
    rhs_lin = padc((mu * inv_var).T)                               # (D, C_pad)
    class_const = padc((-0.5 * jnp.sum(mu * mu * inv_var, axis=1)
                        - jnp.sum(log_sigma, axis=1)
                        - 0.5 * latent_dim * jnp.log(2.0 * jnp.pi))[None, :])
    log_counts = padc(jnp.log(counts.reshape(1, -1).astype(jnp.float32)))

    return dict(
        w_bb=w_bb,
        w_bb_bf16=w_bb.astype(jnp.bfloat16),   # pre-cast once, not per forward
        gamma=gamma, beta=beta,
        mu=mu, log_sigma=log_sigma,
        rhs_sq=rhs_sq, rhs_lin=rhs_lin,
        class_const=class_const, log_counts=log_counts,
        num_classes=int(num_classes),
    )


def _choose_tk(B, K, D):
    """Largest K tile whose double-buffered x (f32) + W (bf16) fit the budget."""
    per_k = 2 * (B * 4 + D * 2)
    tk_max = _TILE_VMEM_BUDGET // per_k
    if tk_max >= K:
        return K                      # single grid step, no K padding needed
    return max(128, (tk_max // 128) * 128)


def posterior_network_forward(x, params):
    """x: (B, C_in, H, W) NCHW float32.  Returns (log_alphas, info)."""
    B = x.shape[0]
    x_flat = x.reshape(B, -1)          # stays f32; cast to bf16 inside kernel
    K = x_flat.shape[1]
    D = params["gamma"].shape[1]
    C = params["num_classes"]
    c_pad = params["log_counts"].shape[1]
    w = params["w_bb_bf16"]

    tk = _choose_tk(B, K, D)
    n_k = -(-K // tk)
    k_pad = n_k * tk
    if k_pad != K:                     # only on the (rare) multi-tile path
        x_flat = jnp.pad(x_flat, ((0, 0), (0, k_pad - K)))
        w = jnp.pad(w, ((0, k_pad - K), (0, 0)))

    cost = pl.CostEstimate(
        flops=2 * B * k_pad * D + 2 * 2 * B * D * c_pad,
        transcendentals=2 * B * c_pad,
        bytes_accessed=(B * k_pad * 4 + k_pad * D * 2
                        + (2 * D * c_pad + 2 * D + 2 * c_pad) * 4
                        + B * 2 * c_pad * 4),
    )

    out = pl.pallas_call(
        posterior_network_kernel,
        out_shape=jax.ShapeDtypeStruct((B, 2 * c_pad), jnp.float32),
        grid_spec=pltpu.PrefetchScalarGridSpec(
            num_scalar_prefetch=0,
            grid=(n_k,),
            in_specs=[
                pl.BlockSpec((B, tk), lambda k: (0, k)),          # x tiles (f32)
                pl.BlockSpec((tk, D), lambda k: (k, 0)),          # W tiles (bf16)
                pl.BlockSpec((1, D), lambda k: (0, 0)),           # gamma
                pl.BlockSpec((1, D), lambda k: (0, 0)),           # beta
                pl.BlockSpec((D, c_pad), lambda k: (0, 0)),       # -0.5*inv_var
                pl.BlockSpec((D, c_pad), lambda k: (0, 0)),       # mu*inv_var
                pl.BlockSpec((1, c_pad), lambda k: (0, 0)),       # class const
                pl.BlockSpec((1, c_pad), lambda k: (0, 0)),       # log counts
            ],
            out_specs=pl.BlockSpec((B, 2 * c_pad), lambda k: (0, 0)),
            scratch_shapes=[pltpu.VMEM((B, D), jnp.float32)],     # z accumulator
        ),
        compiler_params=pltpu.CompilerParams(
            dimension_semantics=("arbitrary",),        # K is a reduction axis
            vmem_limit_bytes=_VMEM_LIMIT_BYTES,
        ),
        cost_estimate=cost,
    )(x_flat, w, params["gamma"], params["beta"], params["rhs_sq"],
      params["rhs_lin"], params["class_const"], params["log_counts"])

    log_alphas = out[:, :C]
    log_probs = out[:, c_pad:c_pad + C]
    info = {"pred": log_alphas, "log_probs_nf": log_probs}
    return log_alphas, info


def reference_forward(x, params):
    """Pure-JAX reference using the direct (un-folded) Gaussian log-density."""
    B = x.shape[0]
    D = params["gamma"].shape[1]
    C = params["num_classes"]
    x_flat = x.reshape(B, -1)
    z = jnp.dot(x_flat.astype(jnp.bfloat16), params["w_bb_bf16"],
                preferred_element_type=jnp.float32)
    mean = jnp.mean(z, axis=0, keepdims=True)
    var = jnp.mean((z - mean) ** 2, axis=0, keepdims=True)
    z_hat = ((z - mean) / jnp.sqrt(var + BN_EPS)
             * params["gamma"] + params["beta"])
    mu = params["mu"]                                  # (C, D)
    log_sigma = params["log_sigma"]                    # (C, D)
    inv_var = jnp.exp(-2.0 * log_sigma)
    diff = z_hat[:, None, :] - mu[None, :, :]          # (B, C, D)
    log_probs = (-0.5 * jnp.sum(diff * diff * inv_var[None], axis=-1)
                 - jnp.sum(log_sigma, axis=-1)[None, :]
                 - 0.5 * D * jnp.log(2.0 * jnp.pi))
    y = log_probs + params["log_counts"][:, :C]
    sp = jnp.log1p(jnp.exp(jnp.minimum(y, SOFTPLUS_THRESHOLD)))
    log_alphas = jnp.where(y > SOFTPLUS_THRESHOLD, y, sp)
    return log_alphas, log_probs


if __name__ == "__main__":
    # Small shapes consistent with the module: NCHW input, latent_dim, classes.
    B, C_in, H, W = 2, 4, 16, 16
    latent_dim = 32
    num_classes = 4
    counts = jnp.asarray([10.0, 20.0, 30.0, 40.0], dtype=jnp.float32)

    key = jax.random.PRNGKey(0)
    k_x, k_p = jax.random.split(key)
    x = jax.random.normal(k_x, (B, C_in, H, W), jnp.float32)
    params = init_params(k_p, C_in * H * W, latent_dim, num_classes, counts)

    log_alphas, info = posterior_network_forward(x, params)
    jax.block_until_ready(log_alphas)
    jax.block_until_ready(info["log_probs_nf"])

    ref_alphas, ref_log_probs = reference_forward(x, params)
    np.testing.assert_allclose(np.asarray(log_alphas), np.asarray(ref_alphas),
                               rtol=1e-2, atol=1e-2)
    np.testing.assert_allclose(np.asarray(info["log_probs_nf"]),
                               np.asarray(ref_log_probs),
                               rtol=1e-2, atol=1e-2)

    print("KERNEL_OK")
</pallas_src>

<mosaic_0001>
module attributes {stable_mosaic.version = 11 : i64} {
  func.func @posterior_network_kernel(%arg0: i32, %arg1: memref<2x1024xf32, #tpu.memory_space<vmem>>, %arg2: memref<1024x32xbf16, #tpu.memory_space<vmem>>, %arg3: memref<1x32xf32, #tpu.memory_space<vmem>>, %arg4: memref<1x32xf32, #tpu.memory_space<vmem>>, %arg5: memref<32x64xf32, #tpu.memory_space<vmem>>, %arg6: memref<32x64xf32, #tpu.memory_space<vmem>>, %arg7: memref<1x64xf32, #tpu.memory_space<vmem>>, %arg8: memref<1x64xf32, #tpu.memory_space<vmem>>, %arg9: memref<2x128xf32, #tpu.memory_space<vmem>>, %arg10: memref<2x32xf32, #tpu.memory_space<vmem>>) attributes {dimension_semantics = [#tpu.dimension_semantics<arbitrary>], iteration_bounds = array<i64: 1>, scalar_prefetch = 0 : i64, scratch_operands = 1 : i64, tpu.core_type = #tpu.core_type<tc>, window_params = [{transform_indices = @transform_0, window_bounds = array<i64: 2, 1024>}, {transform_indices = @transform_1, window_bounds = array<i64: 1024, 32>}, {pipeline_mode = #tpu.pipeline_mode<synchronous>, transform_indices = @transform_2, window_bounds = array<i64: 1, 32>}, {pipeline_mode = #tpu.pipeline_mode<synchronous>, transform_indices = @transform_3, window_bounds = array<i64: 1, 32>}, {pipeline_mode = #tpu.pipeline_mode<synchronous>, transform_indices = @transform_4, window_bounds = array<i64: 32, 64>}, {pipeline_mode = #tpu.pipeline_mode<synchronous>, transform_indices = @transform_5, window_bounds = array<i64: 32, 64>}, {pipeline_mode = #tpu.pipeline_mode<synchronous>, transform_indices = @transform_6, window_bounds = array<i64: 1, 64>}, {pipeline_mode = #tpu.pipeline_mode<synchronous>, transform_indices = @transform_7, window_bounds = array<i64: 1, 64>}, {pipeline_mode = #tpu.pipeline_mode<synchronous>, transform_indices = @transform_8, window_bounds = array<i64: 2, 128>}]} {
    %c0_i32 = arith.constant 0 : i32
    %0 = arith.cmpi eq, %arg0, %c0_i32 : i32
    %1 = arith.extui %0 : i1 to i32
    %c0_i32_0 = arith.constant 0 : i32
    %2 = arith.cmpi ne, %1, %c0_i32_0 : i32
    scf.if %2 {
      %cst_10 = arith.constant 0.000000e+00 : f32
      %13 = vector.broadcast %cst_10 : f32 to vector<2x32xf32>
      %c0_11 = arith.constant 0 : index
      %c0_12 = arith.constant 0 : index
      %14 = vector.load %arg10[%c0_11, %c0_12] : memref<2x32xf32, #tpu.memory_space<vmem>>, vector<2x32xf32>
      tpu.vector_store %arg10[%c0_11, %c0_12], %13 {strides = array<i32>} : memref<2x32xf32, #tpu.memory_space<vmem>>, vector<2x32xf32>,
    } else {
    }
    %c0 = arith.constant 0 : index
    %c0_1 = arith.constant 0 : index
    %3 = vector.load %arg10[%c0, %c0_1] : memref<2x32xf32, #tpu.memory_space<vmem>>, vector<2x32xf32>
    %c0_2 = arith.constant 0 : index
    %c0_3 = arith.constant 0 : index
    %4 = vector.load %arg1[%c0_2, %c0_3] : memref<2x1024xf32, #tpu.memory_space<vmem>>, vector<2x1024xf32>
    %5 = arith.truncf %4 : vector<2x1024xf32> to vector<2x1024xbf16>
    %c0_4 = arith.constant 0 : index
    %c0_5 = arith.constant 0 : index
    %6 = vector.load %arg2[%c0_4, %c0_5] : memref<1024x32xbf16, #tpu.memory_space<vmem>>, vector<1024x32xbf16>
    %cst = arith.constant dense<0.000000e+00> : vector<2x32xf32>
    %7 = tpu.matmul %5, %6, %cst {dimension_numbers = #tpu.dot_dimension_numbers<[1], [0], [0], [1], [0, 0, 1, 1], [], []>} : vector<2x1024xbf16>, vector<1024x32xbf16>, vector<2x32xf32> -> vector<2x32xf32>
    %8 = arith.addf %3, %7 : vector<2x32xf32>
    %c0_6 = arith.constant 0 : index
    %c0_7 = arith.constant 0 : index
    %9 = vector.load %arg10[%c0_6, %c0_7] : memref<2x32xf32, #tpu.memory_space<vmem>>, vector<2x32xf32>
    tpu.vector_store %arg10[%c0_6, %c0_7], %8 {strides = array<i32>} : memref<2x32xf32, #tpu.memory_space<vmem>>, vector<2x32xf32>,
    %c0_i32_8 = arith.constant 0 : i32
    %10 = arith.cmpi eq, %arg0, %c0_i32_8 : i32
    %11 = arith.extui %10 : i1 to i32
    %c0_i32_9 = arith.constant 0 : i32
    %12 = arith.cmpi ne, %11, %c0_i32_9 : i32
    scf.if %12 {
      %c0_10 = arith.constant 0 : index
      %c0_11 = arith.constant 0 : index
      %13 = vector.load %arg10[%c0_10, %c0_11] : memref<2x32xf32, #tpu.memory_space<vmem>>, vector<2x32xf32>
      %cst_12 = arith.constant dense<0.000000e+00> : vector<32xf32>
      %14 = vector.multi_reduction <add>, %13, %cst_12 [0] : vector<2x32xf32> to vector<32xf32>
      %15 = vector.shape_cast %14 : vector<32xf32> to vector<1x32xf32>
      %cst_13 = arith.constant 2.000000e+00 : f32
      %16 = vector.broadcast %cst_13 : f32 to vector<1x32xf32>
      %17 = arith.divf %15, %16 : vector<1x32xf32>
      %18 = arith.mulf %13, %13 : vector<2x32xf32>
      %cst_14 = arith.constant dense<0.000000e+00> : vector<32xf32>
      %19 = vector.multi_reduction <add>, %18, %cst_14 [0] : vector<2x32xf32> to vector<32xf32>
      %20 = vector.shape_cast %19 : vector<32xf32> to vector<1x32xf32>
      %cst_15 = arith.constant 2.000000e+00 : f32
      %21 = vector.broadcast %cst_15 : f32 to vector<1x32xf32>
      %22 = arith.divf %20, %21 : vector<1x32xf32>
      %23 = arith.mulf %17, %17 : vector<1x32xf32>
      %24 = arith.subf %22, %23 : vector<1x32xf32>
      %cst_16 = arith.constant 0.000000e+00 : f32
      %25 = vector.broadcast %cst_16 : f32 to vector<1x32xf32>
      %26 = arith.maximumf %24, %25 : vector<1x32xf32>
      %c0_17 = arith.constant 0 : index
      %c0_18 = arith.constant 0 : index
      %27 = vector.load %arg3[%c0_17, %c0_18] : memref<1x32xf32, #tpu.memory_space<vmem>>, vector<1x32xf32>
      %cst_19 = arith.constant 9.99999974E-6 : f32
      %28 = vector.broadcast %cst_19 : f32 to vector<1x32xf32>
      %29 = arith.addf %26, %28 : vector<1x32xf32>
      %30 = math.rsqrt %29 : vector<1x32xf32>
      %31 = arith.mulf %27, %30 : vector<1x32xf32>
      %c0_20 = arith.constant 0 : index
      %c0_21 = arith.constant 0 : index
      %32 = vector.load %arg4[%c0_20, %c0_21] : memref<1x32xf32, #tpu.memory_space<vmem>>, vector<1x32xf32>
      %33 = arith.mulf %17, %31 : vector<1x32xf32>
      %34 = arith.subf %32, %33 : vector<1x32xf32>
      %35 = vector.broadcast %31 : vector<1x32xf32> to vector<2x32xf32>
      %36 = arith.mulf %13, %35 : vector<2x32xf32>
      %37 = vector.broadcast %34 : vector<1x32xf32> to vector<2x32xf32>
      %38 = arith.addf %36, %37 : vector<2x32xf32>
      %39 = arith.mulf %38, %38 : vector<2x32xf32>
      %c0_22 = arith.constant 0 : index
      %c0_23 = arith.constant 0 : index
      %40 = vector.load %arg5[%c0_22, %c0_23] : memref<32x64xf32, #tpu.memory_space<vmem>>, vector<32x64xf32>
      %cst_24 = arith.constant dense<0.000000e+00> : vector<2x64xf32>
      %41 = tpu.matmul %39, %40, %cst_24 {dimension_numbers = #tpu.dot_dimension_numbers<[1], [0], [0], [1], [0, 0, 1, 1], [], []>} : vector<2x32xf32>, vector<32x64xf32>, vector<2x64xf32> -> vector<2x64xf32>
      %c0_25 = arith.constant 0 : index
      %c0_26 = arith.constant 0 : index
      %42 = vector.load %arg6[%c0_25, %c0_26] : memref<32x64xf32, #tpu.memory_space<vmem>>, vector<32x64xf32>
      %cst_27 = arith.constant dense<0.000000e+00> : vector<2x64xf32>
      %43 = tpu.matmul %38, %42, %cst_27 {dimension_numbers = #tpu.dot_dimension_numbers<[1], [0], [0], [1], [0, 0, 1, 1], [], []>} : vector<2x32xf32>, vector<32x64xf32>, vector<2x64xf32> -> vector<2x64xf32>
      %44 = arith.addf %41, %43 : vector<2x64xf32>
      %c0_28 = arith.constant 0 : index
      %c0_29 = arith.constant 0 : index
      %45 = vector.load %arg7[%c0_28, %c0_29] : memref<1x64xf32, #tpu.memory_space<vmem>>, vector<1x64xf32>
      %46 = vector.broadcast %45 : vector<1x64xf32> to vector<2x64xf32>
      %47 = arith.addf %44, %46 : vector<2x64xf32>
      %c0_30 = arith.constant 0 : index
      %c0_31 = arith.constant 0 : index
      %48 = vector.load %arg8[%c0_30, %c0_31] : memref<1x64xf32, #tpu.memory_space<vmem>>, vector<1x64xf32>
      %49 = vector.broadcast %48 : vector<1x64xf32> to vector<2x64xf32>
      %50 = arith.addf %47, %49 : vector<2x64xf32>
      %cst_32 = arith.constant 2.000000e+01 : f32
      %51 = vector.broadcast %cst_32 : f32 to vector<2x64xf32>
      %52 = arith.minimumf %50, %51 : vector<2x64xf32>
      %53 = math.exp %52 : vector<2x64xf32>
      %54 = math.log1p %53 : vector<2x64xf32>
      %cst_33 = arith.constant 2.000000e+01 : f32
      %55 = vector.broadcast %cst_33 : f32 to vector<2x64xf32>
      %56 = arith.cmpf ogt, %50, %55 : vector<2x64xf32>
      %57 = arith.select %56, %50, %54 : vector<2x64xi1>, vector<2x64xf32>
      %c0_34 = arith.constant 0 : index
      %c0_35 = arith.constant 0 : index
      %58 = vector.load %arg9[%c0_34, %c0_35] : memref<2x128xf32, #tpu.memory_space<vmem>>, vector<2x64xf32>
      tpu.vector_store %arg9[%c0_34, %c0_35], %57 {strides = array<i32>} : memref<2x128xf32, #tpu.memory_space<vmem>>, vector<2x64xf32>,
      %c0_36 = arith.constant 0 : index
      %c64 = arith.constant 64 : index
      %59 = vector.load %arg9[%c0_36, %c64] : memref<2x128xf32, #tpu.memory_space<vmem>>, vector<2x64xf32>
      tpu.vector_store %arg9[%c0_36, %c64], %47 {strides = array<i32>} : memref<2x128xf32, #tpu.memory_space<vmem>>, vector<2x64xf32>,
    } else {
    }
    return
  }
  func.func @transform_0(%arg0: i32) -> (i32, i32) {
    %c0_i32 = arith.constant 0 : i32
    %c0_i32_0 = arith.constant 0 : i32
    return %c0_i32, %arg0 : i32, i32
  }
  func.func @transform_1(%arg0: i32) -> (i32, i32) {
    %c0_i32 = arith.constant 0 : i32
    %c0_i32_0 = arith.constant 0 : i32
    return %arg0, %c0_i32 : i32, i32
  }
  func.func @transform_2(%arg0: i32) -> (i32, i32) {
    %c0_i32 = arith.constant 0 : i32
    %c0_i32_0 = arith.constant 0 : i32
    %c0_i32_1 = arith.constant 0 : i32
    return %c0_i32, %c0_i32_0 : i32, i32
  }
  func.func @transform_3(%arg0: i32) -> (i32, i32) {
    %c0_i32 = arith.constant 0 : i32
    %c0_i32_0 = arith.constant 0 : i32
    %c0_i32_1 = arith.constant 0 : i32
    return %c0_i32, %c0_i32_0 : i32, i32
  }
  func.func @transform_4(%arg0: i32) -> (i32, i32) {
    %c0_i32 = arith.constant 0 : i32
    %c0_i32_0 = arith.constant 0 : i32
    %c0_i32_1 = arith.constant 0 : i32
    return %c0_i32, %c0_i32_0 : i32, i32
  }
  func.func @transform_5(%arg0: i32) -> (i32, i32) {
    %c0_i32 = arith.constant 0 : i32
    %c0_i32_0 = arith.constant 0 : i32
    %c0_i32_1 = arith.constant 0 : i32
    return %c0_i32, %c0_i32_0 : i32, i32
  }
  func.func @transform_6(%arg0: i32) -> (i32, i32) {
    %c0_i32 = arith.constant 0 : i32
    %c0_i32_0 = arith.constant 0 : i32
    %c0_i32_1 = arith.constant 0 : i32
    return %c0_i32, %c0_i32_0 : i32, i32
  }
  func.func @transform_7(%arg0: i32) -> (i32, i32) {
    %c0_i32 = arith.constant 0 : i32
    %c0_i32_0 = arith.constant 0 : i32
    %c0_i32_1 = arith.constant 0 : i32
    return %c0_i32, %c0_i32_0 : i32, i32
  }
  func.func @transform_8(%arg0: i32) -> (i32, i32) {
    %c0_i32 = arith.constant 0 : i32
    %c0_i32_0 = arith.constant 0 : i32
    %c0_i32_1 = arith.constant 0 : i32
    return %c0_i32, %c0_i32_0 : i32, i32
  }
}

</mosaic_0001>

<bundles_post_ra>
// kernel: tpu_custom_call.1
= control target key start
LH: loop header
LB: loop body
LE: loop exit
PB: predicated region body
PF: predicated region fallthrough
CT: control target
= control target key end

     0   :  { %v46_v28 = vlaneseq  ;;  %v1308_v36 = vmov 1983009808   ;;  %s1609_s0 = inlined_call_operand.vmem [shape: f32[2,1024], index: 0, kind: input, shape index: {}]   ;;  %s1610_s1 = inlined_call_operand.vmem [shape: bf16[1024,32], index: 1, kind: input, shape index: {}]   ;;  %s1611_s2 = inlined_call_operand.vmem [shape: f32[1,32], index: 2, kind: input, shape index: {}]   ;;  %s1612_s3 = inlined_call_operand.vmem [shape: f32[1,32], index: 3, kind: input, shape index: {}]   ;;  %s1613_s4 = inlined_call_operand.vmem [shape: f32[32,64], index: 4, kind: input, shape index: {}]   ;;  %s1614_s5 = inlined_call_operand.vmem [shape: f32[32,64], index: 5, kind: input, shape index: {}]   ;;  %s1615_s6 = inlined_call_operand.vmem [shape: f32[1,64], index: 6, kind: input, shape index: {}]   ;;  %s1616_s7 = inlined_call_operand.vmem [shape: f32[1,64], index: 7, kind: input, shape index: {}]   ;;  %s1617_s8 = inlined_call_operand.hbm [shape: f32[2,128], index: 8, kind: output, shape index: {}]  }
   0x1   :  { %v1214_v0 = vld [vmem:[%s1610_s1 + $0x78] sm:$0xff]   ;;  %v1218_v4 = vld [vmem:[%s1610_s1 + $0x70] sm:$0xff]   ;;  %v1222_v8 = vld [vmem:[%s1610_s1 + $0x68] sm:$0xff]   ;;  %v44_v37 = vunpack.c.l.s4 %v1308_v36 }
   0x2   :  { %v1215_v1 = vld [vmem:[%s1610_s1 + $0xf8] sm:$0xff]   ;;  %1089 = vmatprep.subr.bf16.mxu0 %v1214_v0  ;;  %v1219_v5 = vld [vmem:[%s1610_s1 + $0xf0] sm:$0xff]   ;;  %v1223_v9 = vld [vmem:[%s1610_s1 + $0xe8] sm:$0xff]   ;;  %v1454_v33 = vshrl.u32 %v46_v28, 7 }
   0x3   :  { %v1216_v2 = vld [vmem:[%s1610_s1 + $0x38] sm:$0xff]   ;;  %1111 = vmatprep.subr.bf16.mxu1 %v1215_v1  ;;  %v1220_v6 = vld [vmem:[%s1610_s1 + $0x30] sm:$0xff]   ;;  %v1224_v10 = vld [vmem:[%s1610_s1 + $0x28] sm:$0xff]   ;;  %v45_v39 = vunpack.c.0.s8 %v44_v37 }
   0x4   :  { %v1217_v3 = vld [vmem:[%s1610_s1 + $0xb8] sm:$0xff]   ;;  %1090 = vmatpush3.bf16.msra.mxu0 %v1216_v2  ;;  %v1221_v7 = vld [vmem:[%s1610_s1 + $0xb0] sm:$0xff]   ;;  %v1225_v11 = vld [vmem:[%s1610_s1 + $0xa8] sm:$0xff]  }
   0x5   :  { %1112 = vmatpush3.bf16.msra.mxu1 %v1217_v3  ;;  %1091 = vmatprep.subr.bf16.mxu0 %v1218_v4  ;;  %v1226_v12 = vld [vmem:[%s1610_s1 + $0x60] sm:$0xff]   ;;  %v1230_v16 = vld [vmem:[%s1610_s1 + $0x58] sm:$0xff]   ;;  %v1234_v20 = vld [vmem:[%s1610_s1 + $0x50] sm:$0xff]   ;;  %v1466_v41 = vsub.s32 %v45_v39, %v1454_v33 }
   0x6   :  { %1113 = vmatprep.subr.bf16.mxu1 %v1219_v5  ;;  %v1227_v13 = vld [vmem:[%s1610_s1 + $0xe0] sm:$0xff]   ;;  %v1231_v17 = vld [vmem:[%s1610_s1 + $0xd8] sm:$0xff]   ;;  %v1235_v21 = vld [vmem:[%s1610_s1 + $0xd0] sm:$0xff]  }
   0x7   :  { %v1228_v14 = vld [vmem:[%s1610_s1 + $0x20] sm:$0xff]   ;;  %v1232_v18 = vld [vmem:[%s1610_s1 + $0x18] sm:$0xff]   ;;  %v1236_v22 = vld [vmem:[%s1610_s1 + $0x10] sm:$0xff]  }
   0x8   :  { %1092 = vmatpush3.bf16.msra.mxu0 %v1220_v6  ;;  %v1229_v15 = vld [vmem:[%s1610_s1 + $0xa0] sm:$0xff]   ;;  %v1233_v19 = vld [vmem:[%s1610_s1 + $0x98] sm:$0xff]   ;;  %v1237_v23 = vld [vmem:[%s1610_s1 + $0x90] sm:$0xff]  }
   0x9   :  { %1114 = vmatpush3.bf16.msra.mxu1 %v1221_v7  ;;  %1093 = vmatprep.subr.bf16.mxu0 %v1222_v8  ;;  %v1238_v24 = vld [vmem:[%s1610_s1 + $0x48] sm:$0xff]   ;;  %v1242_v29 = vld [vmem:[%s1610_s1 + $0x40] sm:$0xff]   ;;  %v1247_v35 = vld [vmem:[%s1610_s1 + $0x178] sm:$0xff]  }
   0xa   :  { %1115 = vmatprep.subr.bf16.mxu1 %v1223_v9  ;;  %v1239_v25 = vld [vmem:[%s1610_s1 + $0xc8] sm:$0xff]   ;;  %v1243_v30 = vld [vmem:[%s1610_s1 + $0xc0] sm:$0xff]   ;;  %v1248_v38 = vld [vmem:[%s1610_s1 + $0x1f8] sm:$0xff]  }
   0xb   :  { %v1240_v26 = vld [vmem:[%s1610_s1 + $0x8] sm:$0xff]   ;;  %v1244_v31 = vld [vmem:[%s1610_s1] sm:$0xff]   ;;  %v1249_v46 = vld [vmem:[%s1610_s1 + $0x138] sm:$0xff]  }
   0xc   :  { %1094 = vmatpush3.bf16.msra.mxu0 %v1224_v10  ;;  %v1241_v27 = vld [vmem:[%s1610_s1 + $0x88] sm:$0xff]   ;;  %v1245_v32 = vld [vmem:[%s1610_s1 + $0x80] sm:$0xff]   ;;  %v1250_v49 = vld [vmem:[%s1610_s1 + $0x1b8] sm:$0xff]  }
   0xd   :  { %1116 = vmatpush3.bf16.msra.mxu1 %v1225_v11  ;;  %1095 = vmatprep.subr.bf16.mxu0 %v1226_v12  ;;  %v38_v34 = vld [vmem:[%s1609_s0] sm:$0xff]  ;;  %v1251_v52 = vld [vmem:[%s1610_s1 + $0x170] sm:$0xff]   ;;  %v1255_v56 = vld [vmem:[%s1610_s1 + $0x168] sm:$0xff]  }
   0xe   :  { %1117 = vmatprep.subr.bf16.mxu1 %v1227_v13  ;;  %v42_v40 = vcombine.high %v38_v34, %v38_v34  ;;  %v49_v42 = vrot.slane %v38_v34, %v1466_v41  ;;  %v1252_v53 = vld [vmem:[%s1610_s1 + $0x1f0] sm:$0xff]   ;;  %v1256_v57 = vld [vmem:[%s1610_s1 + $0x1e8] sm:$0xff]   ;;  %v1259_v60 = vld [vmem:[%s1610_s1 + $0x160] sm:$0xff]  }
   0xf   :  { %v1253_v54 = vld [vmem:[%s1610_s1 + $0x130] sm:$0xff]   ;;  %v1257_v58 = vld [vmem:[%s1610_s1 + $0x128] sm:$0xff]   ;;  %v1260_v61 = vld [vmem:[%s1610_s1 + $0x1e0] sm:$0xff]  }
  0x10   :  { %1096 = vmatpush3.bf16.msra.mxu0 %v1228_v14  ;;  %v56_v43 = vrot.slane %v42_v40, %v1466_v41  ;;  %v57_v44 = vcombine.high %v49_v42, %v49_v42  ;;  %v84_v47 = vpack.c.bf16 %v49_v42, %v49_v42  ;;  %v1254_v55 = vld [vmem:[%s1610_s1 + $0x1b0] sm:$0xff]   ;;  %v1258_v59 = vld [vmem:[%s1610_s1 + $0x1a8] sm:$0xff]   ;;  %v1261_v62 = vld [vmem:[%s1610_s1 + $0x120] sm:$0xff]  }
  0x11   :  { %1118 = vmatpush3.bf16.msra.mxu1 %v1229_v15  ;;  %1097 = vmatprep.subr.bf16.mxu0 %v1230_v16  ;;  %v1262_v63 = vld [vmem:[%s1610_s1 + $0x1a0] sm:$0xff]   ;;  %v1263_v0 = vld [vmem:[%s1610_s1 + $0x158] sm:$0xff]   ;;  %v1267_v4 = vld [vmem:[%s1610_s1 + $0x150] sm:$0xff]  }
  0x12   :  { %1119 = vmatprep.subr.bf16.mxu1 %v1231_v17  ;;  %v58_v45 = vcombine.high %v56_v43, %v56_v43  ;;  %v86_v48 = vpack.c.bf16 %v56_v43, %v56_v43  ;;  %v85_v50 = vpack.c.bf16 %v57_v44, %v57_v44  ;;  %v1264_v1 = vld [vmem:[%s1610_s1 + $0x1d8] sm:$0xff]   ;;  %v1268_v5 = vld [vmem:[%s1610_s1 + $0x1d0] sm:$0xff]   ;;  %v1271_v8 = vld [vmem:[%s1610_s1 + $0x148] sm:$0xff]  }
  0x13   :  { %v1265_v2 = vld [vmem:[%s1610_s1 + $0x118] sm:$0xff]   ;;  %v1269_v6 = vld [vmem:[%s1610_s1 + $0x110] sm:$0xff]   ;;  %v1272_v9 = vld [vmem:[%s1610_s1 + $0x1c8] sm:$0xff]  }
  0x14   :  { %1098 = vmatpush3.bf16.msra.mxu0 %v1232_v18  ;;  %v87_v51 = vpack.c.bf16 %v58_v45, %v58_v45  ;;  %636 = vmatprep.mubr.bf16.mxu0 %v85_v50  ;;  %v1266_v3 = vld [vmem:[%s1610_s1 + $0x198] sm:$0xff]   ;;  %v1270_v7 = vld [vmem:[%s1610_s1 + $0x190] sm:$0xff]   ;;  %v39_v10 = vld [vmem:[%s1609_s0 + $0x8] sm:$0xff] }
  0x15   :  { %1120 = vmatpush3.bf16.msra.mxu1 %v1233_v19  ;;  %1099 = vmatprep.subr.bf16.mxu0 %v1234_v20 }
  0x16   :  { %1121 = vmatprep.subr.bf16.mxu1 %v1235_v21  ;;  %676 = vmatprep.mubr.bf16.mxu1 %v87_v51 }
  0x18   :  { %1100 = vmatpush3.bf16.msra.mxu0 %v1236_v22 }
  0x19   :  { %1122 = vmatpush3.bf16.msra.mxu1 %v1237_v23  ;;  %1101 = vmatprep.subr.bf16.mxu0 %v1238_v24 }
  0x1a   :  { %1123 = vmatprep.subr.bf16.mxu1 %v1239_v25 }
  0x1c   :  { %1102 = vmatpush3.bf16.msra.mxu0 %v1240_v26 }
  0x1d   :  { %1124 = vmatpush3.bf16.msra.mxu1 %v1241_v27  ;;  %1103 = vmatprep.subr.bf16.mxu0 %v1242_v29 }
  0x1e   :  { %1125 = vmatprep.subr.bf16.mxu1 %v1243_v30 }
  0x20   :  { %1104 = vmatpush3.bf16.msra.mxu0 %v1244_v31 }
  0x21   :  { %1126 = vmatpush3.bf16.msra.mxu1 %v1245_v32  ;;  %1133 = vmatprep.subr.bf16.mxu0 %v1247_v35 }
  0x22   :  { %1155 = vmatprep.subr.bf16.mxu1 %v1248_v38 }
  0x23   :  { %637 = vmatmul.mubr.bf16.vlgmr.msra.gmra.mxu0 %v84_v47 }
  0x24   :  { %677 = vmatmul.mubr.bf16.vlgmr.msra.gmra.mxu1 %v86_v48  ;;  %1134 = vmatpush3.bf16.msra.mxu0 %v1249_v46 }
  0x25   :  { %1156 = vmatpush3.bf16.msra.mxu1 %v1250_v49  ;;  %1135 = vmatprep.subr.bf16.mxu0 %v1251_v52 }
  0x26   :  { %1157 = vmatprep.subr.bf16.mxu1 %v1252_v53 }
  0x28   :  { %1136 = vmatpush3.bf16.msra.mxu0 %v1253_v54 }
  0x29   :  { %1158 = vmatpush3.bf16.msra.mxu1 %v1254_v55  ;;  %1137 = vmatprep.subr.bf16.mxu0 %v1255_v56 }
  0x2a   :  { %1159 = vmatprep.subr.bf16.mxu1 %v1256_v57 }
  0x2c   :  { %1138 = vmatpush3.bf16.msra.mxu0 %v1257_v58 }
  0x2d   :  { %1160 = vmatpush3.bf16.msra.mxu1 %v1258_v59  ;;  %1139 = vmatprep.subr.bf16.mxu0 %v1259_v60 }
  0x2e   :  { %1161 = vmatprep.subr.bf16.mxu1 %v1260_v61 }
  0x30   :  { %1140 = vmatpush3.bf16.msra.mxu0 %v1261_v62 }
  0x31   :  { %1162 = vmatpush3.bf16.msra.mxu1 %v1262_v63  ;;  %1141 = vmatprep.subr.bf16.mxu0 %v1263_v0 }
  0x32   :  { %1163 = vmatprep.subr.bf16.mxu1 %v1264_v1 }
  0x34   :  { %1142 = vmatpush3.bf16.msra.mxu0 %v1265_v2 }
  0x35   :  { %1164 = vmatpush3.bf16.msra.mxu1 %v1266_v3  ;;  %1143 = vmatprep.subr.bf16.mxu0 %v1267_v4 }
  0x36   :  { %1165 = vmatprep.subr.bf16.mxu1 %v1268_v5 }
  0x37   :  { %13 = vsyncpa [#allocation4], 0  ;;  %v66_v11 = vrot.slane %v39_v10, %v1466_v41  ;;  %v59_v12 = vcombine.high %v39_v10, %v39_v10  ;;  %v1273_v13 = vld [vmem:[%s1610_s1 + $0x108] sm:$0xff]   ;;  %v1275_v17 = vld [vmem:[%s1610_s1 + $0x140] sm:$0xff]   ;;  %vm35_vm0 = vcmask 254976   ;;  %v1309_v26 = vmov 0.0  }
  0x38   :  { %1144 = vmatpush3.bf16.msra.mxu0 %v1269_v6  ;;  %v1274_v14 = vld [vmem:[%s1610_s1 + $0x188] sm:$0xff]   ;;  %v1276_v18 = vld [vmem:[%s1610_s1 + $0x1c0] sm:$0xff]   ;;  %36 = vst.msk [vmem:[#allocation2] sm:$0x3] %vm35_vm0, %v1309_v26  ;;  %v821_v27 = vld [vmem:[%s1614_s5 + $0x18] sm:$0xff]  ;;  %vm1310_vm1 = vmmov 0  }
  0x39   :  { %1166 = vmatpush3.bf16.msra.mxu1 %v1270_v7  ;;  %v74_v15 = vcombine.high %v66_v11, %v66_v11  ;;  %v73_v16 = vrot.slane %v59_v12, %v1466_v41  ;;  %1145 = vmatprep.subr.bf16.mxu0 %v1271_v8  ;;  %v1277_v21 = vld [vmem:[%s1610_s1 + $0x100] sm:$0xff]   ;;  %v88_v24 = vpack.c.bf16 %v66_v11, %v66_v11  ;;  %v817_v28 = vld [vmem:[%s1613_s4 + $0x18] sm:$0xff]  ;;  %v820_v29 = vld [vmem:[%s1614_s5 + $0x10] sm:$0xff]  ;;  %vm822_vm2 = vcmask 261120   ;;  %s1311_s22 = smov 64  }
  0x3a   :  { %1167 = vmatprep.subr.bf16.mxu1 %v1272_v9  ;;  %v1278_v22 = vld [vmem:[%s1610_s1 + $0x180] sm:$0xff]   ;;  %v816_v30 = vld [vmem:[%s1613_s4 + $0x10] sm:$0xff]  ;;  %v819_v31 = vld [vmem:[%s1614_s5 + $0x8] sm:$0xff]  ;;  %vm999_vm4 = vcmask 517120   ;;  %vm1005_vm6 = vcmask 1041920  }
  0x3b   :  { %v89_v19 = vpack.c.bf16 %v74_v15, %v74_v15  ;;  %v75_v20 = vcombine.high %v73_v16, %v73_v16  ;;  %v90_v25 = vpack.c.bf16 %v73_v16, %v73_v16  ;;  %v815_v32 = vld [vmem:[%s1613_s4 + $0x8] sm:$0xff]  ;;  %v818_v34 = vld [vmem:[%s1614_s5] sm:$0xff] }
  0x3c   :  { %1146 = vmatpush3.bf16.msra.mxu0 %v1273_v13  ;;  %v814_v35 = vld [vmem:[%s1613_s4] sm:$0xff] }
  0x3d   :  { %1168 = vmatpush3.bf16.msra.mxu1 %v1274_v14  ;;  %v91_v23 = vpack.c.bf16 %v75_v20, %v75_v20  ;;  %1147 = vmatprep.subr.bf16.mxu0 %v1275_v17  ;;  %v802_v20 = vsub.s32 0, %v1454_v33  ;;  %v1087_v33 = vld [vmem:[%s1615_s6] ss:$0 sm:$0xff]  ;;  %s1312_s6 = smov [#allocation3]  }
  0x3e   :  { %1169 = vmatprep.subr.bf16.mxu1 %v1276_v18  ;;  %716 = vmatprep.mubr.bf16.mxu0 %v89_v19  ;;  %v792_v19 = vld [vmem:[%s1611_s2] sm:$0x1] }
  0x3f   :  { %756 = vmatprep.mubr.bf16.mxu1 %v91_v23  ;;  %v37_v56 = vld [vmem:[#allocation2] sm:$0x3] }
  0x40   :  { %1148 = vmatpush3.bf16.msra.mxu0 %v1277_v21  ;;  %v796_v23 = vld [vmem:[%s1612_s3] sm:$0x1] }
  0x41   :  { %1170 = vmatpush3.bf16.msra.mxu1 %v1278_v22  ;;  %1187 = vmatprep.subr.mxu0 %v1309_v26 }
  0x42   :  { %1198 = vmatprep.subr.mxu1 %v1309_v26 }
  0x43   :  { %717 = vmatmul.mubr.bf16.vlgmr.msra.gmra.mxu0 %v88_v24 }
  0x44   :  { %757 = vmatmul.mubr.bf16.vlgmr.msra.gmra.mxu1 %v90_v25  ;;  %1188 = vmatpush3.msra.mxu0 %v821_v27 }
  0x45   :  { %1199 = vmatpush3.msra.mxu1 %v817_v28  ;;  %1189 = vmatprep.subr.mxu0 %v1309_v26 }
  0x46   :  { %1200 = vmatprep.subr.mxu1 %v1309_v26  ;;  %1190 = vmatpush3.msra.mxu0 %v820_v29 }
  0x47   :  { %1201 = vmatpush3.msra.mxu1 %v816_v30  ;;  %1191 = vmatprep.subr.mxu0 %v1309_v26 }
  0x48   :  { %1202 = vmatprep.subr.mxu1 %v1309_v26  ;;  %1192 = vmatpush3.msra.mxu0 %v819_v31 }
  0x49   :  { %1203 = vmatpush3.msra.mxu1 %v815_v32  ;;  %1193 = vmatprep.subr.mxu0 %v1309_v26 }
  0x4a   :  { %1195 = vmatprep.mubr.msk.f32.mxu0 %vm1310_vm1, %v1309_v26  ;;  %1194 = vmatpush3.msra.mxu0 %v818_v34 }
  0x4b   :  { %1204 = vmatprep.subr.mxu1 %v1309_v26  ;;  %1206 = vmatprep.mubr.msk.f32.mxu1 %vm1310_vm1, %v1309_v26 }
  0x4c   :  { %1205 = vmatpush3.msra.mxu1 %v814_v35 }
  0xe3   :  { %v1105_v36 = vpop.f32.mrf.mxu0 }
  0xe4   :  { %v1127_v37 = vpop.f32.mrf.mxu1 }
  0xe5   :  { %v1106_v38 = vpop.f32.mrf.mxu0 }
  0xe6   :  { %v1128_v39 = vpop.f32.mrf.mxu1  ;;  %v1107_v44 = vadd.f32 %v1106_v38, %v1105_v36 }
  0xe7   :  { %v1108_v40 = vpop.f32.mrf.mxu0  ;;  %v1129_v45 = vadd.f32 %v1128_v39, %v1127_v37  ;;  %v1088_v37 = vld [vmem:[%s1616_s7] ss:$0 sm:$0xff]  ;;  %s1013_s7 = sshll.u32 %s1312_s6, 4  ;;  %s1014_s7 = int_to_ptr.vmem [resolvable:$true] %s1013_s7 }
  0xe8   :  { %v1130_v41 = vpop.f32.mrf.mxu1  ;;  %s1286_s23 = scalar_lea.vmem %s1014_s7, 32  ;;  %p1291_p1 = scmp.lt.s32.totalorder %s1014_s7, %s1014_s7 }
  0xe9   :  { %v1109_v42 = vpop.f32.mrf.mxu0  ;;  %v679_v50 = vadd.f32 %v1129_v45, %v1107_v44  ;;  %p1287_p0 = scmp.ne.s32.totalorder %s1014_s7, %s1286_s23  ;;  %p1292_p2 = scmp.lt.s32.totalorder %s1286_s23, %s1286_s23 }
  0xea   :  { %v1131_v43 = vpop.f32.mrf.mxu1 }
  0xeb   :  { %p1293_p3 = por %p1292_p2, %p1291_p1 }
  0xed   :  { %p1294_p4 = pnand %p1293_p3, %p1287_p0 }
 0x103   :  { %v1149_v46 = vpop.f32.mrf.mxu0 }
 0x104   :  { %v1171_v47 = vpop.f32.mrf.mxu1 }
 0x105   :  { %v1150_v48 = vpop.f32.mrf.mxu0 }
 0x106   :  { %v1172_v49 = vpop.f32.mrf.mxu1  ;;  %v1151_v51 = vadd.f32 %v1150_v48, %v1149_v46 }
 0x107   :  { %v1152_v52 = vpop.f32.mrf.mxu0  ;;  %v1173_v55 = vadd.f32 %v1172_v49, %v1171_v47 }
 0x108   :  { %v1174_v53 = vpop.f32.mrf.mxu1  ;;  %v719_v54 = vadd.f32 %v1151_v51, %v679_v50 }
 0x109   :  { %v1153_v57 = vpop.f32.mrf.mxu0 }
 0x10a   :  { %v1175_v58 = vpop.f32.mrf.mxu1  ;;  %v759_v59 = vadd.f32 %v1173_v55, %v719_v54 }
 0x10c   :  { %v764_v60 = vadd.f32 %v759_v59, %v37_v56 }
 0x10e   :  { %766 = vst.msk [vmem:[#allocation2] sm:$0x3] %vm35_vm0, %v764_v60 }
 0x115   :  { %v770_v61 = vld [vmem:[#allocation2] sm:$0x3] }
 0x116   :  { %v771_v62 = vsel %vm35_vm0, %v770_v61, 0.0  ;;  %v780_v63 = vmul.f32 %v770_v61, %v770_v61 }
 0x117   :  { %v772_v0 = vrot.slane %v771_v62, 4 }
 0x118   :  { %v781_v1 = vsel %vm35_vm0, %v780_v63, 0.0 }
 0x119   :  { %v773_v2 = vadd.f32 %v772_v0, %v771_v62  ;;  %v782_v3 = vrot.slane %v781_v1, 4 }
 0x11b   :  { %v774_v4 = vrot.slane %v773_v2, 2  ;;  %v783_v5 = vadd.f32 %v782_v3, %v781_v1 }
 0x11d   :  { %v775_v6 = vadd.f32 %v774_v4, %v773_v2  ;;  %v784_v7 = vrot.slane %v783_v5, 2 }
 0x11f   :  { %v776_v8 = vrot.slane %v775_v6, 1  ;;  %v785_v9 = vadd.f32 %v784_v7, %v783_v5 }
 0x121   :  { %v777_v10 = vadd.f32 %v776_v8, %v775_v6  ;;  %v786_v11 = vrot.slane %v785_v9, 1 }
 0x123   :  { %v779_v12 = vmul.f32 0.5, %v777_v10  ;;  %v787_v13 = vadd.f32 %v786_v11, %v785_v9 }
 0x125   :  { %v788_v14 = vmul.f32 0.5, %v787_v13  ;;  %v789_v15 = vmul.f32 %v779_v12, %v779_v12 }
 0x127   :  { %v790_v16 = vsub.f32 %v788_v14, %v789_v15 }
 0x129   :  { %v791_v17 = vmax.f32 %v790_v16, 0.0 }
 0x12b   :  { %v793_v18 = vadd.f32 1e-05, %v791_v17 }
 0x12d   :  { %1280 = vrsqrt.f32 %v793_v18 }
 0x13a   :  { %v1281_v21 = vpop.eup %1280 }
 0x13b   :  { %v795_v22 = vmul.f32 %v1281_v21, %v792_v19 }
 0x13d   :  { %v797_v24 = vmul.f32 %v795_v22, %v779_v12  ;;  %v803_v25 = vrot.slane %v795_v22, %v802_v20 }
 0x13f   :  { %v798_v26 = vsub.f32 %v796_v23, %v797_v24  ;;  %v805_v27 = vmul.f32 %v803_v25, %v770_v61 }
 0x141   :  { %v810_v28 = vrot.slane %v798_v26, %v802_v20 }
 0x143   :  { %v812_v29 = vadd.f32 %v810_v28, %v805_v27 }
 0x145   :  { %1196 = vmatmul.mubr.msk.f32.vlgmr.msra.gmra.mxu0 %vm822_vm2, %v812_v29  ;;  %v813_v30 = vmul.f32 %v812_v29, %v812_v29 }
 0x147   :  { %1207 = vmatmul.mubr.msk.f32.vlgmr.msra.gmra.mxu1 %vm822_vm2, %v813_v30 }
 0x205   :  { %v892_v31 = vpop.f32.mrf.mxu0 }
 0x207   :  { %v1197_v32 = vpop.f32.mrf.mxu0  ;;  %v965_v34 = vpop.f32.mrf.mxu1 }
 0x208   :  { %v966_v35 = vadd.f32 %v965_v34, %v892_v31 }
 0x209   :  { %v1208_v36 = vpop.f32.mrf.mxu1 }
 0x20a   :  { %v976_v38 = vadd.f32 %v1087_v33, %v966_v35 }
 0x20c   :  { %v984_v39 = vadd.f32 %v1088_v37, %v976_v38  ;;  %1002 = vrot.lane.b32.xlu0 %v976_v38, %s1311_s22 }
 0x20e   :  { %v985_v40 = vmin.f32 %v984_v39, 20.0  ;;  %vm997_vm5 = vcmp.gt.f32.partialorder %v984_v39, 20.0 }
 0x210   :  { %v986_v41 = vmul.f32 1.442695, %v985_v40 }
 0x212   :  { %1282 = vpow2.f32 %v986_v41 }
 0x21f   :  { %v1283_v42 = vpop.eup %1282 }
 0x220   :  { %v988_v43 = vadd.f32 1.0, %v1283_v42  ;;  %v991_v44 = vmul.f32 -0.5, %v1283_v42  ;;  %v994_v46 = vand.u32 2147483647, %v1283_v42 }
 0x222   :  { %1284 = vlog2.f32 %v988_v43  ;;  %v992_v45 = vadd.f32 1.0, %v991_v44  ;;  %vm995_vm3 = vcmp.lt.f32.partialorder %v994_v46, 0.0004427343 }
 0x224   :  { %v993_v49 = vmul.f32 %v1283_v42, %v992_v45 }
 0x22f   :  { %v1285_v47 = vpop.eup %1284 }
 0x230   :  { %v990_v48 = vmul.f32 0.6931472, %v1285_v47 }
 0x232   :  { %v996_v50 = vsel %vm995_vm3, %v993_v49, %v990_v48 }
 0x233   :  { %v998_v51 = vsel %vm997_vm5, %v984_v39, %v996_v50 }
 0x234   :  { %1000 = vst.msk [vmem:[#allocation3] sm:$0x3] %vm999_vm4, %v998_v51 }
 0x27e   :  { %v1003_v52 = vpop.permute.xlu0 %1002 }
 0x27f   :  { %1006 = vst.msk [vmem:[#allocation3] sm:$0x3] %vm1005_vm6, %v1003_v52 }
 0x280   :  { %1297 = shalt.err (!%p1294_p4)
}
 0x281   :  { %1016 = dma.vmem_to_hbm [thread:$0]  %s1014_s7, 32, %s1617_s8, [#allocation4]  }
 0x282   :  { %1306 = dma.done.wait [#allocation4], 32  }
 0x283   :  { %1307 = vsyncadd [#allocation4], 4294967264 }
 0x284   :  { %1020 = vsyncpa [#allocation4], 1 }

</bundles_post_ra>
